<compile_context>
chip_gen: v5e
topology: v5e:2x2
jax: 0.10.0
libtpu: 0.0.40
codegen_flags: <defaults>
</compile_context>

<pallas_src>
import jax
import jax.numpy as jnp
from jax.experimental import pallas as pl
from jax.experimental.pallas import tpu as pltpu


def _round_up(a: int, b: int) -> int:
    return (a + b - 1) // b * b


def _patch_embed_kernel(p_ref, w_ref, b_ref, o_ref):
    # p_ref: (tm, K)  compute-dtype patch rows
    # w_ref: (K, td)  compute-dtype projection weight tile (resident across M loop)
    # b_ref: (1, td)  f32 bias tile
    # o_ref: (tm, td) output tile (output dtype)
    acc = jnp.dot(p_ref[...], w_ref[...], preferred_element_type=jnp.float32)
    o_ref[...] = (acc + b_ref[...]).astype(o_ref.dtype)


def _select_tiles(M, K, D, cd_size, out_size, budget_bytes):
    """Pick (tm, td, vmem_estimate).  Prefers a single lane-dense D tile
    (weight resident), then the largest M tile that fits the VMEM budget,
    keeping >= 2 M tiles when M is large enough (v7x megacore)."""
    M8 = _round_up(M, 8)
    D128 = _round_up(D, 128)

    # td candidates: multiples of 128 that divide round_up(D, 128), largest first
    td_cands = [t for t in range(D128, 0, -128) if D128 % t == 0]

    # tm candidates
    if M8 <= 256:
        tm_cands = [M8]                      # single small row tile
    else:
        half = min(_round_up(-(-M8 // 2), 8), 2048)   # aim for >= 2 row tiles
        tm_cands = [half] + [t for t in (2048, 1024, 512, 256, 128) if t < half]

    def vmem_bytes(tm, td):
        return (2 * tm * K * cd_size        # patches (double-buffered)
                + 2 * K * td * cd_size      # weight  (double-buffered alloc)
                + 2 * td * 4                # bias (f32)
                + 2 * tm * td * out_size)   # output (double-buffered)

    for td in td_cands:
        for tm in tm_cands:
            v = vmem_bytes(tm, td)
            if v <= budget_bytes:
                return tm, td, v
    tm, td = tm_cands[-1], td_cands[-1]
    return tm, td, vmem_bytes(tm, td)


def patch_embeddings(x, weight, bias, patch_size, *, compute_dtype=jnp.bfloat16):
    """x: (B, C, H, W) NCHW.  weight: (D, C, P, P).  bias: (D,).
    Returns (B, (H/P)*(W/P), D) -- same semantics as the PyTorch module."""
    B, C, H, W = x.shape
    P = patch_size
    D = weight.shape[0]
    assert H % P == 0 and W % P == 0
    Hp, Wp = H // P, W // P

    cd = jnp.dtype(compute_dtype)
    out_dtype = x.dtype

    # --- glue: extract non-overlapping patches, flattened in (c, kh, kw) order
    # (matches nn.Conv2d weight (D, C, kH, kW) flattened to (D, C*P*P)).
    # Cast to the compute dtype first; allow_input_fusion lets XLA fuse this
    # gather into the pallas_call operand instead of a round trip through HBM.
    xc = x.astype(cd)
    patches = xc.reshape(B, C, Hp, P, Wp, P).transpose(0, 2, 4, 1, 3, 5)
    patches = patches.reshape(B * Hp * Wp, C * P * P)

    w_mat = weight.reshape(D, C * P * P).T.astype(cd)     # (K, D)
    b_mat = bias.reshape(1, D).astype(jnp.float32)        # (1, D), bias add kept in f32

    M, K = patches.shape

    # --- tile selection (VMEM budget conservative for v7x's 64 MiB) ---
    VMEM_BUDGET = 40 * 1024 * 1024
    tm, td, vmem_est = _select_tiles(M, K, D, cd.itemsize,
                                     jnp.dtype(out_dtype).itemsize, VMEM_BUDGET)
    M_pad = _round_up(M, tm)
    D_pad = _round_up(_round_up(D, 128), td)

    if M_pad != M:
        patches = jnp.pad(patches, ((0, M_pad - M), (0, 0)))
    if D_pad != D:
        w_mat = jnp.pad(w_mat, ((0, 0), (0, D_pad - D)))
        b_mat = jnp.pad(b_mat, ((0, 0), (0, D_pad - D)))

    # D axis OUTER so the weight/bias block index is constant across the inner M
    # loop -> weight is DMA'd from HBM exactly once (per D tile).
    grid = (D_pad // td, M_pad // tm)

    cost = pl.CostEstimate(
        flops=2 * M * K * D,
        transcendentals=0,
        bytes_accessed=(M * K * cd.itemsize
                        + K * D * cd.itemsize
                        + D * 4
                        + M * D * jnp.dtype(out_dtype).itemsize),
    )

    vmem_limit = int(max(vmem_est + 4 * 1024 * 1024, 16 * 1024 * 1024))

    out = pl.pallas_call(
        _patch_embed_kernel,
        out_shape=jax.ShapeDtypeStruct((M_pad, D_pad), out_dtype),
        grid_spec=pltpu.PrefetchScalarGridSpec(
            num_scalar_prefetch=0,
            grid=grid,
            in_specs=[
                pl.BlockSpec((tm, K), lambda j, i: (i, 0)),
                pl.BlockSpec((K, td), lambda j, i: (0, j)),
                pl.BlockSpec((1, td), lambda j, i: (0, j)),
            ],
            out_specs=pl.BlockSpec((tm, td), lambda j, i: (i, j)),
        ),
        compiler_params=pltpu.CompilerParams(
            dimension_semantics=("parallel", "parallel"),
            vmem_limit_bytes=vmem_limit,
            allow_input_fusion=[True, False, False],
        ),
        cost_estimate=cost,
    )(patches, w_mat, b_mat)

    out = out[:M, :D]   # no-op when M, D already aligned
    return out.reshape(B, Hp * Wp, D)


if __name__ == "__main__":
    # Small shapes consistent with the module: B=2, C=4, H=W=16, patch=4, hidden=32
    B, C, H, W = 2, 4, 16, 16
    patch_size = 4
    hidden_dim = 32

    key = jax.random.PRNGKey(0)
    kx, kw, kb = jax.random.split(key, 3)

    x = jax.random.normal(kx, (B, C, H, W), dtype=jnp.float32)
    # deterministic parameter init (synthetic; not a checkpoint load)
    weight = jax.random.normal(kw, (hidden_dim, C, patch_size, patch_size),
                               dtype=jnp.float32) * 0.02
    bias = jax.random.normal(kb, (hidden_dim,), dtype=jnp.float32) * 0.02

    fwd = jax.jit(lambda xx, ww, bb: patch_embeddings(xx, ww, bb, patch_size))
    out = fwd(x, weight, bias)
    out = jax.block_until_ready(out)

    # reference check against lax conv (same semantics as nn.Conv2d stride=kernel)
    ref = jax.lax.conv_general_dilated(
        x, weight, window_strides=(patch_size, patch_size), padding="VALID",
        dimension_numbers=("NCHW", "OIHW", "NCHW"))
    ref = ref + bias.reshape(1, hidden_dim, 1, 1)
    ref = ref.reshape(B, hidden_dim, -1).transpose(0, 2, 1)  # b c h w -> b (h w) c

    assert out.shape == (B, (H // patch_size) * (W // patch_size), hidden_dim)
    # bf16 compute operands with f32 accumulation -> loose-ish tolerance vs f32 ref
    assert jnp.allclose(out, ref, atol=2e-2, rtol=2e-2)
    print("KERNEL_OK")
</pallas_src>

<mosaic_0001>
module attributes {stable_mosaic.version = 11 : i64} {
  func.func @_patch_embed_kernel(%arg0: i32, %arg1: i32, %arg2: memref<32x64xbf16, #tpu.memory_space<vmem>>, %arg3: memref<64x128xbf16, #tpu.memory_space<vmem>>, %arg4: memref<1x128xf32, #tpu.memory_space<vmem>>, %arg5: memref<32x128xf32, #tpu.memory_space<vmem>>) attributes {dimension_semantics = [#tpu.dimension_semantics<parallel>, #tpu.dimension_semantics<parallel>], iteration_bounds = array<i64: 1, 1>, scalar_prefetch = 0 : i64, scratch_operands = 0 : i64, tpu.core_type = #tpu.core_type<tc>, window_params = [{transform_indices = @transform_0, window_bounds = array<i64: 32, 64>}, {transform_indices = @transform_1, window_bounds = array<i64: 64, 128>}, {transform_indices = @transform_2, window_bounds = array<i64: 1, 128>}, {transform_indices = @transform_3, window_bounds = array<i64: 32, 128>}]} {
    %c0 = arith.constant 0 : index
    %c0_0 = arith.constant 0 : index
    %0 = vector.load %arg2[%c0, %c0_0] : memref<32x64xbf16, #tpu.memory_space<vmem>>, vector<32x64xbf16>
    %c0_1 = arith.constant 0 : index
    %c0_2 = arith.constant 0 : index
    %1 = vector.load %arg3[%c0_1, %c0_2] : memref<64x128xbf16, #tpu.memory_space<vmem>>, vector<64x128xbf16>
    %cst = arith.constant dense<0.000000e+00> : vector<32x128xf32>
    %2 = tpu.matmul %0, %1, %cst {dimension_numbers = #tpu.dot_dimension_numbers<[1], [0], [0], [1], [0, 0, 1, 1], [], []>} : vector<32x64xbf16>, vector<64x128xbf16>, vector<32x128xf32> -> vector<32x128xf32>
    %c0_3 = arith.constant 0 : index
    %c0_4 = arith.constant 0 : index
    %3 = vector.load %arg4[%c0_3, %c0_4] : memref<1x128xf32, #tpu.memory_space<vmem>>, vector<1x128xf32>
    %4 = vector.broadcast %3 : vector<1x128xf32> to vector<32x128xf32>
    %5 = arith.addf %2, %4 : vector<32x128xf32>
    %c0_5 = arith.constant 0 : index
    %c0_6 = arith.constant 0 : index
    %6 = vector.load %arg5[%c0_5, %c0_6] : memref<32x128xf32, #tpu.memory_space<vmem>>, vector<32x128xf32>
    tpu.vector_store %arg5[%c0_5, %c0_6], %5 {strides = array<i32>} : memref<32x128xf32, #tpu.memory_space<vmem>>, vector<32x128xf32>,
    return
  }
  func.func @transform_0(%arg0: i32, %arg1: i32) -> (i32, i32) {
    %c0_i32 = arith.constant 0 : i32
    %c0_i32_0 = arith.constant 0 : i32
    return %arg1, %c0_i32 : i32, i32
  }
  func.func @transform_1(%arg0: i32, %arg1: i32) -> (i32, i32) {
    %c0_i32 = arith.constant 0 : i32
    %c0_i32_0 = arith.constant 0 : i32
    return %c0_i32, %arg0 : i32, i32
  }
  func.func @transform_2(%arg0: i32, %arg1: i32) -> (i32, i32) {
    %c0_i32 = arith.constant 0 : i32
    %c0_i32_0 = arith.constant 0 : i32
    return %c0_i32, %arg0 : i32, i32
  }
  func.func @transform_3(%arg0: i32, %arg1: i32) -> (i32, i32) {
    %c0_i32 = arith.constant 0 : i32
    return %arg1, %arg0 : i32, i32
  }
}

</mosaic_0001>

<bundles_post_ra>
// kernel: _lambda_.1
= control target key start
LH: loop header
LB: loop body
LE: loop exit
PB: predicated region body
PF: predicated region fallthrough
CT: control target
= control target key end

     0   :  { %s227_s0 = inlined_call_operand.vmem [shape: bf16[32,64], index: 0, kind: input, shape index: {}]   ;;  %s228_s1 = inlined_call_operand.vmem [shape: bf16[64,128], index: 1, kind: input, shape index: {}]   ;;  %s229_s2 = inlined_call_operand.vmem [shape: f32[1,128], index: 2, kind: input, shape index: {}]   ;;  %s230_s3 = inlined_call_operand.hbm [shape: f32[32,128], index: 3, kind: output, shape index: {}]  }
   0x1   :  { %v145_v0 = vld [vmem:[%s228_s1 + $0x18] sm:$0xff]  ;;  %v144_v1 = vld [vmem:[%s228_s1 + $0x10] sm:$0xff] }
   0x2   :  { %77 = vmatpush.bf16.msra.mxu0 %v145_v0  ;;  %146 = vmatpush.bf16.msra.mxu1 %v145_v0 }
   0x3   :  { %8 = vsyncpa [#allocation3], 0  ;;  %v143_v2 = vld [vmem:[%s228_s1 + $0x8] sm:$0xff]  ;;  %v142_v3 = vld [vmem:[%s228_s1] sm:$0xff]  ;;  %vm66_vm0 = vcmask 523264   ;;  %s180_s1 = smov [#allocation2]  }
   0x4   :  { %v140_v4 = vld [vmem:[%s227_s0] sm:$0xff]  ;;  %v141_v5 = vld [vmem:[%s227_s0 + $0x8] sm:$0xff]  ;;  %s100_s26 = sshll.u32 %s180_s1, 4  ;;  %s102_s0 = sshll.u32 %s230_s3, 4  ;;  %s101_s26 = int_to_ptr.vmem [resolvable:$true] %s100_s26  ;;  %s103_s0 = int_to_ptr.hbm [resolvable:$true] %s102_s0 }
   0x5   :  { %v153_v6 = vld [vmem:[%s229_s2] ss:$0 sm:$0xff]  ;;  %s181_s2 = smov 128   ;;  %s182_s29 = smov 8  }
   0x6   :  { %78 = vmatpush.bf16.msra.mxu0 %v144_v1  ;;  %147 = vmatpush.bf16.msra.mxu1 %v144_v1 }
   0xa   :  { %79 = vmatpush.bf16.msra.mxu0 %v143_v2  ;;  %148 = vmatpush.bf16.msra.mxu1 %v143_v2 }
   0xe   :  { %80 = vmatpush.bf16.msra.mxu0 %v142_v3  ;;  %149 = vmatpush.bf16.msra.mxu1 %v142_v3 }
  0x11   :  { %138 = vmatmul.msk.bf16.vlgmr.msra.gmra.mxu0 %vm66_vm0, %v140_v4  ;;  %139 = vmatmul.msk.bf16.vlgmr.msra.gmra.mxu1 %vm66_vm0, %v141_v5 }
  0x8e   :  { %v82_v7 = vpop.f32.mrf.mxu0  ;;  %v87_v8 = vpop.f32.mrf.mxu1 }
  0x8f   :  { %v83_v9 = vadd.f32 %v153_v6, %v82_v7  ;;  %v88_v10 = vadd.f32 %v153_v6, %v87_v8 }
  0x91   :  { %92 = vst [vmem:[#allocation2] sm:$0xff] %v83_v9 }
  0x92   :  { %94 = vst [vmem:[#allocation2 + $0x10] sm:$0xff] %v88_v10 }
  0x96   :  { %v84_v11 = vpop.f32.mrf.mxu0  ;;  %v89_v12 = vpop.f32.mrf.mxu1 }
  0x97   :  { %v85_v13 = vadd.f32 %v153_v6, %v84_v11  ;;  %v90_v14 = vadd.f32 %v153_v6, %v89_v12 }
  0x99   :  { %93 = vst [vmem:[#allocation2 + $0x8] sm:$0xff] %v85_v13 }
  0x9a   :  { %95 = vst [vmem:[#allocation2 + $0x18] sm:$0xff] %v90_v14 }
  0x9b   :  { %108 = dma.vmem_to_hbm [thread:$0]  %s101_s26, 512, %s103_s0, [#allocation3], %s181_s2, %s181_s2, %s182_s29  }
  0x9c   :  { %178 = dma.done.wait [#allocation3], 512  }
  0x9d   :  { %179 = vsyncadd [#allocation3], 4294966784 }
  0x9e   :  { %113 = vsyncpa [#allocation3], 1 }

</bundles_post_ra>
